<compile_context>
chip_gen: v7x
topology: tpu7x:2x2x1
jax: 0.10.0
libtpu: 0.0.40
codegen_flags: <defaults>
</compile_context>

<pallas_src>
import functools

import jax
import jax.numpy as jnp
from jax.experimental import pallas as pl
from jax.experimental.pallas import tpu as pltpu


def _mlp_kernel(x_ref, p_ref, o_ref, *, in_dim, hidden):
    x = x_ref[...]                          # (B, in_dim)

    # First (8, H) tile of the packed slab: W1 rows then b1, b2, b3 (padded).
    head = p_ref[0:8, :]                    # (8, H)
    b1 = head[in_dim, :]                    # (H,)
    b2 = head[in_dim + 1, :]                # (H,)
    b3 = head[in_dim + 2, :]                # (H,)  zeros past out_dim

    # Layer 1: K=in_dim (=4) underfills the MXU -> VPU broadcast-FMAs.
    h1 = b1 + x[:, 0:1] * head[0, :]
    for k in range(1, in_dim):
        h1 = h1 + x[:, k:k + 1] * head[k, :]
    h1 = jnp.maximum(h1, 0.0)

    # Layer 2: well-shaped (B,128)@(128,128) -> MXU.
    w2 = p_ref[8:8 + hidden, :]             # (H, H)
    h2 = jnp.maximum(jnp.dot(h1, w2, preferred_element_type=jnp.float32) + b2, 0.0)

    # Layer 3: W3 zero-padded to (H, H) so the matmul is well-shaped and the output
    # store is a full-lane unmasked store; valid Q-values live in the first out_dim lanes.
    w3 = p_ref[8 + hidden:8 + 2 * hidden, :]  # (H, H)
    o_ref[...] = (jnp.dot(h2, w3, preferred_element_type=jnp.float32)
                  + b3).astype(o_ref.dtype)


def pack_params(w1, b1, w2, b2, w3, b3):
    """One-time packing of all params into a single dense VMEM slab (outside the hot path).

    Layout (rows of a (8 + 2*H, H) f32 array):
      rows [0:in_dim]         : W1 (stored (in, out))
      row  in_dim             : b1
      row  in_dim + 1         : b2
      row  in_dim + 2         : b3 (zero-padded past out_dim)
      rows [8 : 8+H]          : W2
      rows [8+H : 8+2H]       : W3 zero-padded to (H, H)
    """
    in_dim, hidden = w1.shape
    out_dim = w3.shape[1]
    assert in_dim + 3 <= 8, "packing assumes W1 rows + 3 bias rows fit one (8,128) tile"
    slab = jnp.zeros((8 + 2 * hidden, hidden), jnp.float32)
    slab = slab.at[:in_dim, :].set(w1.astype(jnp.float32))
    slab = slab.at[in_dim, :].set(b1.astype(jnp.float32))
    slab = slab.at[in_dim + 1, :].set(b2.astype(jnp.float32))
    slab = slab.at[in_dim + 2, :out_dim].set(b3.astype(jnp.float32))
    slab = slab.at[8:8 + hidden, :].set(w2.astype(jnp.float32))
    slab = slab.at[8 + hidden:8 + 2 * hidden, :out_dim].set(w3.astype(jnp.float32))
    return slab


def dqn_forward(x, packed, out_dim):
    batch, in_dim = x.shape
    hidden = packed.shape[1]
    kernel = functools.partial(_mlp_kernel, in_dim=in_dim, hidden=hidden)
    # Gridless call: single invocation, each operand is one VMEM-resident block (no pipeline).
    out = pl.pallas_call(
        kernel,
        out_shape=jax.ShapeDtypeStruct((batch, hidden), jnp.float32),
        in_specs=[pl.BlockSpec(memory_space=pltpu.MemorySpace.VMEM),
                  pl.BlockSpec(memory_space=pltpu.MemorySpace.VMEM)],
        out_specs=pl.BlockSpec(memory_space=pltpu.MemorySpace.VMEM),
    )(x, packed)
    # Lane-dense kernel output; slice the real Q-values in the JAX wrapper.
    return out[:, :out_dim]


def init_params(key, input_dim, hidden, output_dim):
    k1, k2, k3, k4, k5, k6 = jax.random.split(key, 6)
    # kaiming_normal_-style init: std = sqrt(2 / fan_in); weights stored as (in, out)
    w1 = jax.random.normal(k1, (input_dim, hidden), jnp.float32) * jnp.sqrt(2.0 / input_dim)
    b1 = jax.random.normal(k4, (hidden,), jnp.float32) * 0.05
    w2 = jax.random.normal(k2, (hidden, hidden), jnp.float32) * jnp.sqrt(2.0 / hidden)
    b2 = jax.random.normal(k5, (hidden,), jnp.float32) * 0.05
    w3 = jax.random.normal(k3, (hidden, output_dim), jnp.float32) * jnp.sqrt(2.0 / hidden)
    b3 = jax.random.normal(k6, (output_dim,), jnp.float32) * 0.05
    return w1, b1, w2, b2, w3, b3


if __name__ == "__main__":
    input_dim, hidden, output_dim = 4, 128, 2   # CartPole-v1: 4 observations, 2 actions
    batch = 8

    key = jax.random.PRNGKey(0)
    pkey, xkey = jax.random.split(key)
    w1, b1, w2, b2, w3, b3 = init_params(pkey, input_dim, hidden, output_dim)
    packed = pack_params(w1, b1, w2, b2, w3, b3)
    x = jax.random.normal(xkey, (batch, input_dim), jnp.float32)

    out = dqn_forward(x, packed, output_dim)
    out = jax.block_until_ready(out)

    # Plain-JAX reference (same math as the PyTorch forward: relu(l1) -> relu(l2) -> l3).
    # Layer 1 uses highest precision to match the kernel's exact f32 VPU FMAs.
    h = jnp.maximum(jnp.dot(x, w1, precision=jax.lax.Precision.HIGHEST) + b1, 0.0)
    h = jnp.maximum(h @ w2 + b2, 0.0)
    ref = h @ w3 + b3

    assert out.shape == (batch, output_dim)
    assert jnp.allclose(out, ref, atol=1e-4, rtol=1e-4), float(jnp.max(jnp.abs(out - ref)))

    print("KERNEL_OK")
</pallas_src>

<mosaic_0001>
module attributes {stable_mosaic.version = 11 : i64} {
  func.func @_mlp_kernel(%arg0: memref<8x4xf32, #tpu.memory_space<vmem>>, %arg1: memref<264x128xf32, #tpu.memory_space<vmem>>, %arg2: memref<8x128xf32, #tpu.memory_space<vmem>>) attributes {dimension_semantics = [], scalar_prefetch = 0 : i64, scratch_operands = 0 : i64, tpu.core_type = #tpu.core_type<tc>} {
    %c0 = arith.constant 0 : index
    %c0_0 = arith.constant 0 : index
    %0 = vector.load %arg0[%c0, %c0_0] : memref<8x4xf32, #tpu.memory_space<vmem>>, vector<8x4xf32>
    %c0_1 = arith.constant 0 : index
    %c0_2 = arith.constant 0 : index
    %1 = vector.load %arg1[%c0_1, %c0_2] : memref<264x128xf32, #tpu.memory_space<vmem>>, vector<8x128xf32>
    %2 = vector.extract_strided_slice %1 {offsets = [4, 0], sizes = [1, 128], strides = [1, 1]} : vector<8x128xf32> to vector<1x128xf32>
    %3 = vector.shape_cast %2 : vector<1x128xf32> to vector<128xf32>
    %4 = vector.extract_strided_slice %1 {offsets = [5, 0], sizes = [1, 128], strides = [1, 1]} : vector<8x128xf32> to vector<1x128xf32>
    %5 = vector.shape_cast %4 : vector<1x128xf32> to vector<128xf32>
    %6 = vector.extract_strided_slice %1 {offsets = [6, 0], sizes = [1, 128], strides = [1, 1]} : vector<8x128xf32> to vector<1x128xf32>
    %7 = vector.shape_cast %6 : vector<1x128xf32> to vector<128xf32>
    %8 = vector.extract_strided_slice %0 {offsets = [0, 0], sizes = [8, 1], strides = [1, 1]} : vector<8x4xf32> to vector<8x1xf32>
    %9 = vector.extract_strided_slice %1 {offsets = [0, 0], sizes = [1, 128], strides = [1, 1]} : vector<8x128xf32> to vector<1x128xf32>
    %10 = vector.shape_cast %9 : vector<1x128xf32> to vector<128xf32>
    %11 = vector.shape_cast %10 : vector<128xf32> to vector<1x128xf32>
    %12 = vector.broadcast %8 : vector<8x1xf32> to vector<8x128xf32>
    %13 = vector.broadcast %11 : vector<1x128xf32> to vector<8x128xf32>
    %14 = arith.mulf %12, %13 : vector<8x128xf32>
    %15 = vector.shape_cast %3 : vector<128xf32> to vector<1x128xf32>
    %16 = vector.broadcast %15 : vector<1x128xf32> to vector<8x128xf32>
    %17 = arith.addf %16, %14 : vector<8x128xf32>
    %18 = vector.extract_strided_slice %0 {offsets = [0, 1], sizes = [8, 1], strides = [1, 1]} : vector<8x4xf32> to vector<8x1xf32>
    %19 = vector.extract_strided_slice %1 {offsets = [1, 0], sizes = [1, 128], strides = [1, 1]} : vector<8x128xf32> to vector<1x128xf32>
    %20 = vector.shape_cast %19 : vector<1x128xf32> to vector<128xf32>
    %21 = vector.shape_cast %20 : vector<128xf32> to vector<1x128xf32>
    %22 = vector.broadcast %18 : vector<8x1xf32> to vector<8x128xf32>
    %23 = vector.broadcast %21 : vector<1x128xf32> to vector<8x128xf32>
    %24 = arith.mulf %22, %23 : vector<8x128xf32>
    %25 = arith.addf %17, %24 : vector<8x128xf32>
    %26 = vector.extract_strided_slice %0 {offsets = [0, 2], sizes = [8, 1], strides = [1, 1]} : vector<8x4xf32> to vector<8x1xf32>
    %27 = vector.extract_strided_slice %1 {offsets = [2, 0], sizes = [1, 128], strides = [1, 1]} : vector<8x128xf32> to vector<1x128xf32>
    %28 = vector.shape_cast %27 : vector<1x128xf32> to vector<128xf32>
    %29 = vector.shape_cast %28 : vector<128xf32> to vector<1x128xf32>
    %30 = vector.broadcast %26 : vector<8x1xf32> to vector<8x128xf32>
    %31 = vector.broadcast %29 : vector<1x128xf32> to vector<8x128xf32>
    %32 = arith.mulf %30, %31 : vector<8x128xf32>
    %33 = arith.addf %25, %32 : vector<8x128xf32>
    %34 = vector.extract_strided_slice %0 {offsets = [0, 3], sizes = [8, 1], strides = [1, 1]} : vector<8x4xf32> to vector<8x1xf32>
    %35 = vector.extract_strided_slice %1 {offsets = [3, 0], sizes = [1, 128], strides = [1, 1]} : vector<8x128xf32> to vector<1x128xf32>
    %36 = vector.shape_cast %35 : vector<1x128xf32> to vector<128xf32>
    %37 = vector.shape_cast %36 : vector<128xf32> to vector<1x128xf32>
    %38 = vector.broadcast %34 : vector<8x1xf32> to vector<8x128xf32>
    %39 = vector.broadcast %37 : vector<1x128xf32> to vector<8x128xf32>
    %40 = arith.mulf %38, %39 : vector<8x128xf32>
    %41 = arith.addf %33, %40 : vector<8x128xf32>
    %cst = arith.constant 0.000000e+00 : f32
    %42 = vector.broadcast %cst : f32 to vector<8x128xf32>
    %43 = arith.maximumf %41, %42 : vector<8x128xf32>
    %c8 = arith.constant 8 : index
    %c0_3 = arith.constant 0 : index
    %44 = vector.load %arg1[%c8, %c0_3] : memref<264x128xf32, #tpu.memory_space<vmem>>, vector<128x128xf32>
    %cst_4 = arith.constant dense<0.000000e+00> : vector<8x128xf32>
    %45 = tpu.matmul %43, %44, %cst_4 {dimension_numbers = #tpu.dot_dimension_numbers<[1], [0], [0], [1], [0, 0, 1, 1], [], []>} : vector<8x128xf32>, vector<128x128xf32>, vector<8x128xf32> -> vector<8x128xf32>
    %46 = vector.shape_cast %5 : vector<128xf32> to vector<1x128xf32>
    %47 = vector.broadcast %46 : vector<1x128xf32> to vector<8x128xf32>
    %48 = arith.addf %45, %47 : vector<8x128xf32>
    %cst_5 = arith.constant 0.000000e+00 : f32
    %49 = vector.broadcast %cst_5 : f32 to vector<8x128xf32>
    %50 = arith.maximumf %48, %49 : vector<8x128xf32>
    %c136 = arith.constant 136 : index
    %c0_6 = arith.constant 0 : index
    %51 = vector.load %arg1[%c136, %c0_6] : memref<264x128xf32, #tpu.memory_space<vmem>>, vector<128x128xf32>
    %cst_7 = arith.constant dense<0.000000e+00> : vector<8x128xf32>
    %52 = tpu.matmul %50, %51, %cst_7 {dimension_numbers = #tpu.dot_dimension_numbers<[1], [0], [0], [1], [0, 0, 1, 1], [], []>} : vector<8x128xf32>, vector<128x128xf32>, vector<8x128xf32> -> vector<8x128xf32>
    %53 = vector.shape_cast %7 : vector<128xf32> to vector<1x128xf32>
    %54 = vector.broadcast %53 : vector<1x128xf32> to vector<8x128xf32>
    %55 = arith.addf %52, %54 : vector<8x128xf32>
    %c0_8 = arith.constant 0 : index
    %c0_9 = arith.constant 0 : index
    %56 = vector.load %arg2[%c0_8, %c0_9] : memref<8x128xf32, #tpu.memory_space<vmem>>, vector<8x128xf32>
    tpu.vector_store %arg2[%c0_8, %c0_9], %55 {strides = array<i32>} : memref<8x128xf32, #tpu.memory_space<vmem>>, vector<8x128xf32>,
    return
  }
}

</mosaic_0001>

<bundles_post_ra>
// kernel: tpu_custom_call.1
= control target key start
LH: loop header
LB: loop body
LE: loop exit
PB: predicated region body
PF: predicated region fallthrough
CT: control target
= control target key end

     0   :  { %7 = vsyncpa [#allocation3], 0  ;;  %s556_s0 = inlined_call_operand.vmem [shape: f32[8,4], index: 0, kind: input, shape index: {}]   ;;  %s557_s1 = inlined_call_operand.hbm [shape: f32[264,128], index: 1, kind: input, shape index: {}]   ;;  %s558_s2 = inlined_call_operand.hbm [shape: f32[8,128], index: 2, kind: output, shape index: {}]  }
   0x1   :  { %8 = vsyncpa [#allocation4], 0  ;;  %s487_s9 = smov [#allocation2]   ;;  %s439_s13 = scalar_lea.hbm %s557_s1, 4224 }
   0x2   :  { %s16_s10 = sshll.u32 %s487_s9, 4  ;;  %p440_p0 = scmp.ne.s32.totalorder %s557_s1, %s439_s13  ;;  %s17_s10 = int_to_ptr.vmem [resolvable:$true] %s16_s10 }
   0x3   :  { %p443_p1 = scmp.lt.u32.totalorder %s439_s13, %s557_s1 }
   0x5   :  { %p445_p2 = pnand %p443_p1, %p440_p0 }
   0x7   :  { %448 = shalt.err (!%p445_p2)
}
   0x8   :  { %s449_s18 = scalar_lea.vmem %s17_s10, 4224  ;;  %p454_p4 = scmp.lt.s32.totalorder %s17_s10, %s17_s10 }
   0x9   :  { %p450_p3 = scmp.ne.s32.totalorder %s17_s10, %s449_s18  ;;  %p455_p5 = scmp.lt.s32.totalorder %s449_s18, %s449_s18 }
   0xb   :  { %p456_p6 = por %p455_p5, %p454_p4 }
   0xd   :  { %p457_p7 = pnand %p456_p6, %p450_p3 }
   0xf   :  { %460 = shalt.err (!%p457_p7)
}
  0x10   :  { %s488_s19 = smov 128   ;;  %s489_s20 = smov 8  }
  0x11   :  { %22 = dma.hbm_to_vmem [thread:$0]  %s557_s1, 4224, %s17_s10, [#allocation3], %s488_s19, %s488_s19, %s489_s20  }
  0x12   :  { %483 = dma.done.wait [#allocation3], 4224  }
  0x13   :  { %484 = vsyncadd [#allocation3], 4294963072  ;;  %v490_v0 = vmov 0   ;;  %v491_v1 = vmov 2   ;;  %v492_v2 = vmov 0.0|0.0   ;;  %v26_v3 = vld [vmem:[%s556_s0] sm:$0xff]  ;;  %v33_v52 = vlaneseq }
  0x14   :  { %434 = vset.pattern.permute.xlu0 %v490_v0  ;;  %436 = vset.pattern.permute.xlu1 %v491_v1  ;;  %v74_v4 = vld [vmem:[#allocation2 + $0x8] sm:$0xff]  ;;  %v75_v5 = vld [vmem:[#allocation2 + $0x10] sm:$0xff]  ;;  %v76_v7 = vld [vmem:[#allocation2 + $0x18] sm:$0xff]  ;;  %v493_v12 = vmov 1   ;;  %v494_v13 = vmov 3   ;;  %vm495_vm0 = vmmov 0  }
  0x15   :  { %375 = vmatprep.subr.bf16.mxu0 %v492_v2  ;;  %399 = vmatprep.subr.bf16.mxu1 %v492_v2  ;;  %v376_v6 = vpack.c.bf16 %v75_v5, %v74_v4  ;;  %v77_v8 = vld [vmem:[#allocation2 + $0x20] sm:$0xff]  ;;  %v78_v10 = vld [vmem:[#allocation2 + $0x28] sm:$0xff]  ;;  %v79_v11 = vld [vmem:[#allocation2 + $0x30] sm:$0xff]  ;;  %v496_v23 = vmov 0.0   ;;  %v34_v53 = vshrl.u32 %v33_v52, 7  ;;  %s497_s0 = smov [#allocation5]  }
  0x16   :  { %30 = vperm.xlu0 %434, %v26_v3   ;;  %54 = vperm.xlu1 %436, %v26_v3   ;;  %v379_v9 = vpack.c.bf16 %v77_v8, %v76_v7  ;;  %v382_v14 = vpack.c.bf16 %v79_v11, %v78_v10  ;;  %v80_v15 = vld [vmem:[#allocation2 + $0x38] sm:$0xff]  ;;  %v81_v16 = vld [vmem:[#allocation2 + $0x40] sm:$0xff]  ;;  %v82_v18 = vld [vmem:[#allocation2 + $0x48] sm:$0xff]  ;;  %s262_s1 = sshll.u32 %s497_s0, 4  ;;  %s263_s1 = int_to_ptr.vmem [resolvable:$true] %s262_s1 }
  0x17   :  { %377 = vmatpush3.bf16.msra.mxu0 %v376_v6  ;;  %v385_v17 = vpack.c.bf16 %v81_v16, %v80_v15  ;;  %v83_v19 = vld [vmem:[#allocation2 + $0x50] sm:$0xff]  ;;  %v84_v21 = vld [vmem:[#allocation2 + $0x58] sm:$0xff]  ;;  %v85_v22 = vld [vmem:[#allocation2 + $0x60] sm:$0xff]  ;;  %337 = vmatprep.mubr.msk.f32.mxu0 %vm495_vm0, %v496_v23  ;;  %v35_v54 = vsub.s32 0, %v34_v53  ;;  %v40_v57 = vsub.s32 4, %v34_v53  ;;  %v49_v58 = vsub.s32 1, %v34_v53  ;;  %p466_p9 = scmp.lt.s32.totalorder %s263_s1, %s263_s1 }
  0x18   :  { %378 = vmatprep.subr.bf16.mxu0 %v492_v2  ;;  %v388_v20 = vpack.c.bf16 %v83_v19, %v82_v18  ;;  %v165_v24 = vld [vmem:[#allocation2 + $0x88] sm:$0xff]  ;;  %v166_v25 = vld [vmem:[#allocation2 + $0x90] sm:$0xff]  ;;  %v167_v26 = vld [vmem:[#allocation2 + $0x98] sm:$0xff]  ;;  %372 = vmatprep.mubr.msk.f32.mxu1 %vm495_vm0, %v496_v23  ;;  %v391_v29 = vpack.c.bf16 %v85_v22, %v84_v21  ;;  %v59_v60 = vsub.s32 2, %v34_v53  ;;  %v69_v62 = vsub.s32 3, %v34_v53  ;;  %s461_s25 = scalar_lea.vmem %s263_s1, 128 }
  0x19   :  { %v400_v27 = vpack.c.bf16 %v166_v25, %v165_v24  ;;  %v168_v28 = vld [vmem:[#allocation2 + $0xa0] sm:$0xff]  ;;  %v86_v30 = vld [vmem:[#allocation2 + $0x68] sm:$0xff]  ;;  %v87_v32 = vld [vmem:[#allocation2 + $0x70] sm:$0xff]  ;;  %v183_v23 = vsub.s32 6, %v34_v53  ;;  %p462_p8 = scmp.ne.s32.totalorder %s263_s1, %s461_s25  ;;  %p467_p10 = scmp.lt.s32.totalorder %s461_s25, %s461_s25 }
  0x1a   :  { %435 = vset.pattern.permute.xlu0 %v493_v12  ;;  %437 = vset.pattern.permute.xlu1 %v494_v13  ;;  %v403_v31 = vpack.c.bf16 %v168_v28, %v167_v26  ;;  %v169_v33 = vld [vmem:[#allocation2 + $0xa8] sm:$0xff]  ;;  %v170_v34 = vld [vmem:[#allocation2 + $0xb0] sm:$0xff]  ;;  %v394_v35 = vpack.c.bf16 %v87_v32, %v86_v30  ;;  %v88_v36 = vld [vmem:[#allocation2 + $0x78] sm:$0xff] }
  0x1b   :  { %44 = vperm.xlu0 %435, %v26_v3   ;;  %64 = vperm.xlu1 %437, %v26_v3   ;;  %v406_v37 = vpack.c.bf16 %v170_v34, %v169_v33  ;;  %v89_v38 = vld [vmem:[#allocation2 + $0x80] sm:$0xff]  ;;  %v171_v39 = vld [vmem:[#allocation2 + $0xb8] sm:$0xff]  ;;  %v173_v43 = vld [vmem:[#allocation2 + $0xc8] sm:$0xff]  ;;  %p468_p11 = por %p467_p10, %p466_p9 }
  0x1c   :  { %380 = vmatpush3.bf16.msra.mxu0 %v379_v9  ;;  %401 = vmatpush3.bf16.msra.mxu1 %v400_v27  ;;  %v172_v40 = vld [vmem:[#allocation2 + $0xc0] sm:$0xff]  ;;  %v397_v41 = vpack.c.bf16 %v89_v38, %v88_v36  ;;  %v174_v44 = vld [vmem:[#allocation2 + $0xd0] sm:$0xff]  ;;  %v175_v46 = vld [vmem:[#allocation2 + $0xd8] sm:$0xff] }
  0x1d   :  { %381 = vmatprep.subr.bf16.mxu0 %v492_v2  ;;  %402 = vmatprep.subr.bf16.mxu1 %v492_v2  ;;  %v409_v42 = vpack.c.bf16 %v172_v40, %v171_v39  ;;  %v412_v45 = vpack.c.bf16 %v174_v44, %v173_v43  ;;  %v176_v47 = vld [vmem:[#allocation2 + $0xe0] sm:$0xff]  ;;  %v177_v49 = vld [vmem:[#allocation2 + $0xe8] sm:$0xff]  ;;  %v178_v50 = vld [vmem:[#allocation2 + $0xf0] sm:$0xff]  ;;  %p469_p12 = pnand %p468_p11, %p462_p8 }
  0x1e   :  { %v415_v48 = vpack.c.bf16 %v176_v47, %v175_v46  ;;  %v418_v51 = vpack.c.bf16 %v178_v50, %v177_v49  ;;  %v27_v55 = vld [vmem:[#allocation2] sm:$0xff] }
  0x1f   :  { %438 = vset.pattern.permute.xlu0 %v494_v13  ;;  %v36_v56 = vrot.slane %v27_v55, %v35_v54  ;;  %v41_v63 = vrot.slane %v27_v55, %v40_v57  ;;  %v50_v1 = vrot.slane %v27_v55, %v49_v58  ;;  %v60_v3 = vrot.slane %v27_v55, %v59_v60  ;;  %v180_v15 = vld [vmem:[#allocation2 + $0x100] sm:$0xff] }
  0x20   :  { %383 = vmatpush3.bf16.msra.mxu0 %v382_v14  ;;  %404 = vmatpush3.bf16.msra.mxu1 %v403_v31  ;;  %v70_v4 = vrot.slane %v27_v55, %v69_v62  ;;  %v179_v14 = vld [vmem:[#allocation2 + $0xf8] sm:$0xff]  ;;  %v184_v24 = vrot.slane %v27_v55, %v183_v23 }
  0x21   :  { %384 = vmatprep.subr.bf16.mxu0 %v492_v2  ;;  %405 = vmatprep.subr.bf16.mxu1 %v492_v2  ;;  %v421_v16 = vpack.c.bf16 %v180_v15, %v179_v14 }
  0x24   :  { %386 = vmatpush3.bf16.msra.mxu0 %v385_v17  ;;  %407 = vmatpush3.bf16.msra.mxu1 %v406_v37  ;;  %v92_v17 = vsub.s32 5, %v34_v53 }
  0x25   :  { %387 = vmatprep.subr.bf16.mxu0 %v492_v2  ;;  %408 = vmatprep.subr.bf16.mxu1 %v492_v2 }
  0x26   :  { %v93_v18 = vrot.slane %v27_v55, %v92_v17 }
  0x28   :  { %389 = vmatpush3.bf16.msra.mxu0 %v388_v20  ;;  %410 = vmatpush3.bf16.msra.mxu1 %v409_v42 }
  0x29   :  { %390 = vmatprep.subr.bf16.mxu0 %v492_v2  ;;  %411 = vmatprep.subr.bf16.mxu1 %v492_v2 }
  0x2c   :  { %392 = vmatpush3.bf16.msra.mxu0 %v391_v29  ;;  %413 = vmatpush3.bf16.msra.mxu1 %v412_v45 }
  0x2d   :  { %393 = vmatprep.subr.bf16.mxu0 %v492_v2  ;;  %414 = vmatprep.subr.bf16.mxu1 %v492_v2 }
  0x30   :  { %395 = vmatpush3.bf16.msra.mxu0 %v394_v35  ;;  %416 = vmatpush3.bf16.msra.mxu1 %v415_v48 }
  0x31   :  { %396 = vmatprep.subr.bf16.mxu0 %v492_v2  ;;  %417 = vmatprep.subr.bf16.mxu1 %v492_v2 }
  0x34   :  { %398 = vmatpush3.bf16.msra.mxu0 %v397_v41  ;;  %419 = vmatpush3.bf16.msra.mxu1 %v418_v51 }
  0x35   :  { %420 = vmatprep.subr.bf16.mxu1 %v492_v2 }
  0x38   :  { %422 = vmatpush3.bf16.msra.mxu1 %v421_v16 }
  0x95   :  { %v31_v59 = vpop.permute.xlu0 %30  ;;  %v55_v61 = vpop.permute.xlu1 %54 }
  0x96   :  { %v37_v0 = vmul.f32 %v36_v56, %v31_v59  ;;  %v61_v8 = vmul.f32 %v60_v3, %v55_v61 }
  0x98   :  { %v42_v7 = vadd.f32 %v41_v63, %v37_v0 }
  0x9a   :  { %v45_v5 = vpop.permute.xlu0 %44  ;;  %v65_v6 = vpop.permute.xlu1 %64 }
  0x9b   :  { %v51_v2 = vmul.f32 %v50_v1, %v45_v5  ;;  %v71_v10 = vmul.f32 %v70_v4, %v65_v6 }
  0x9d   :  { %v52_v9 = vadd.f32 %v51_v2, %v42_v7 }
  0x9f   :  { %v62_v11 = vadd.f32 %v61_v8, %v52_v9 }
  0xa1   :  { %v72_v12 = vadd.f32 %v71_v10, %v62_v11 }
  0xa3   :  { %v73_v13 = vmax.f32 %v72_v12, 0.0 }
  0xa5   :  { %338 = vmatmul.mubr.f32.vlgmr.msra.gmra.mrb[0].mxu0 %v73_v13 }
 0x178   :  { %v160_v19 = vpop.f32.mrb[0].mxu0 }
 0x179   :  { %v161_v20 = vadd.f32 %v160_v19, %v93_v18  ;;  %v339_v21 = vpop.f32.mrb[1].mxu0 }
 0x17b   :  { %v164_v22 = vmax.f32 %v161_v20, 0.0 }
 0x17d   :  { %373 = vmatmul.mubr.f32.vlgmr.msra.gmra.mrb[0].mxu1 %v164_v22 }
 0x250   :  { %v251_v25 = vpop.f32.mrb[0].mxu1 }
 0x251   :  { %v252_v26 = vadd.f32 %v251_v25, %v184_v24  ;;  %v374_v27 = vpop.f32.mrb[1].mxu1 }
 0x253   :  { %255 = vst [vmem:[#allocation5] sm:$0xff] %v252_v26 }
 0x254   :  { %472 = shalt.err (!%p469_p12)
}
 0x255   :  { %s473_s28 = scalar_lea.hbm %s558_s2, 128 }
 0x256   :  { %p474_p13 = scmp.ne.s32.totalorder %s558_s2, %s473_s28  ;;  %p477_p0 = scmp.lt.u32.totalorder %s473_s28, %s558_s2 }
 0x258   :  { %p479_p1 = pnand %p477_p0, %p474_p13 }
 0x25a   :  { %482 = shalt.err (!%p479_p1)
}
 0x25b   :  { %265 = dma.vmem_to_hbm [thread:$0]  %s263_s1, 128, %s558_s2, [#allocation4]  }
 0x25c   :  { %485 = dma.done.wait [#allocation4], 128  }
 0x25d   :  { %486 = vsyncadd [#allocation4], 4294967168 }
 0x25e   :  { %269 = vsyncpa [#allocation3], 1 }
 0x25f   :  { %270 = vsyncpa [#allocation4], 1 }

</bundles_post_ra>
